<compile_context>
chip_gen: v7x
topology: tpu7x:2x2x1
jax: 0.10.0
libtpu: 0.0.40
codegen_flags: <defaults>
</compile_context>

<pallas_src>
import math

import jax
import jax.numpy as jnp
from jax.experimental import pallas as pl
from jax.experimental.pallas import tpu as pltpu

BN_EPS = 1e-5                          # nn.BatchNorm1d default eps
_VMEM_LIMIT_BYTES = 48 * 1024 * 1024   # headroom but below v7x's 64 MiB physical VMEM
_TILE_CANDIDATES = (512, 256, 128)     # multiples of (8,128); MXU-friendly


def _pick_tile(dim, candidates=_TILE_CANDIDATES):
    """Largest MXU-friendly tile that divides `dim`, else the full dimension."""
    for t in candidates:
        if dim >= t and dim % t == 0:
            return t
    return dim


# ---------------------------------------------------------------------------
# Kernel 1a: tiled matmul + bias + per-tile BN sum/sumsq accumulators.
#   grid = (n_m, n_k); k (reduction) is the last, "arbitrary" axis.
# ---------------------------------------------------------------------------
def _matmul_stats_kernel(x_ref, w_ref, b_ref, h_ref, stats_ref, acc_ref):
    k = pl.program_id(1)

    @pl.when(k == 0)
    def _init():
        acc_ref[...] = jnp.zeros_like(acc_ref)

    acc_ref[...] += jnp.dot(x_ref[...], w_ref[...],
                            preferred_element_type=jnp.float32)

    @pl.when(k == pl.num_programs(1) - 1)
    def _finalize():
        h = acc_ref[...] + b_ref[...]
        h_ref[...] = h
        s = jnp.sum(h, axis=0, keepdims=True)
        sq = jnp.sum(h * h, axis=0, keepdims=True)
        stats_ref[0] = jnp.concatenate([s, sq], axis=0)


# ---------------------------------------------------------------------------
# Kernel 1b: same, but the previous LinearBlock's folded BN+ReLU is applied to
# the x tile on load (y = relu(x*scale + shift)) before the bf16 MXU matmul.
# ---------------------------------------------------------------------------
def _bnrelu_matmul_stats_kernel(x_ref, scale_ref, shift_ref, w_ref, b_ref,
                                h_ref, stats_ref, acc_ref):
    k = pl.program_id(1)

    @pl.when(k == 0)
    def _init():
        acc_ref[...] = jnp.zeros_like(acc_ref)

    x = jnp.maximum(x_ref[...] * scale_ref[...] + shift_ref[...], 0.0)
    acc_ref[...] += jnp.dot(x.astype(jnp.bfloat16), w_ref[...],
                            preferred_element_type=jnp.float32)

    @pl.when(k == pl.num_programs(1) - 1)
    def _finalize():
        h = acc_ref[...] + b_ref[...]
        h_ref[...] = h
        s = jnp.sum(h, axis=0, keepdims=True)
        sq = jnp.sum(h * h, axis=0, keepdims=True)
        stats_ref[0] = jnp.concatenate([s, sq], axis=0)


def _tiled_matmul_stats(x, w, b, scale=None, shift=None):
    """h = [relu(x*scale+shift)] @ w + b, tiled; also per-M-tile column (sum, sumsq)."""
    M, Cin = x.shape
    Cout = w.shape[1]
    tm = _pick_tile(M)
    tk = _pick_tile(Cin)
    n_m, n_k = M // tm, Cin // tk

    fused = scale is not None
    kernel = _bnrelu_matmul_stats_kernel if fused else _matmul_stats_kernel

    in_specs = [pl.BlockSpec((tm, tk), lambda m, k: (m, k))]
    args = [x]
    if fused:
        in_specs += [pl.BlockSpec((1, tk), lambda m, k: (0, k)),
                     pl.BlockSpec((1, tk), lambda m, k: (0, k))]
        args += [scale.reshape(1, Cin).astype(jnp.float32),
                 shift.reshape(1, Cin).astype(jnp.float32)]
    in_specs += [pl.BlockSpec((tk, Cout), lambda m, k: (k, 0)),
                 pl.BlockSpec((1, Cout), lambda m, k: (0, 0))]
    args += [w, b.reshape(1, Cout).astype(jnp.float32)]

    flops = 2 * M * Cin * Cout
    bytes_accessed = int(x.size * x.dtype.itemsize + w.size * w.dtype.itemsize
                         + (M + 2 * n_m) * Cout * 4)

    h, stats = pl.pallas_call(
        kernel,
        out_shape=(jax.ShapeDtypeStruct((M, Cout), jnp.float32),
                   jax.ShapeDtypeStruct((n_m, 2, Cout), jnp.float32)),
        grid=(n_m, n_k),
        in_specs=in_specs,
        out_specs=(pl.BlockSpec((tm, Cout), lambda m, k: (m, 0)),
                   pl.BlockSpec((1, 2, Cout), lambda m, k: (m, 0, 0))),
        scratch_shapes=[pltpu.VMEM((tm, Cout), jnp.float32)],
        compiler_params=pltpu.CompilerParams(
            dimension_semantics=("parallel", "arbitrary"),
            vmem_limit_bytes=_VMEM_LIMIT_BYTES),
        cost_estimate=pl.CostEstimate(flops=flops, transcendentals=0,
                                      bytes_accessed=bytes_accessed),
    )(*args)
    return h, stats


def _bn_fold(stats, m_total, gamma, beta):
    """Fold training-mode (biased) BN stats + affine into y = h*scale + shift."""
    total = jnp.sum(stats, axis=0)                               # (2, C)
    mean = total[0] / m_total
    var = jnp.maximum(total[1] / m_total - mean * mean, 0.0)
    scale = gamma * jax.lax.rsqrt(var + BN_EPS)
    shift = beta - mean * scale
    return scale.reshape(1, -1), shift.reshape(1, -1)


# ---------------------------------------------------------------------------
# Kernel 2: folded BN + ReLU + mean over N (VFE finalize), one batch sample per step.
# ---------------------------------------------------------------------------
def _bn_relu_mean_kernel(h_ref, scale_ref, shift_ref, o_ref):
    # h: (1, N, C)   scale/shift: (1, C)   o: (1, 1, C)
    y = jnp.maximum(h_ref[0] * scale_ref[...] + shift_ref[...], 0.0)
    o_ref[0] = jnp.mean(y, axis=0, keepdims=True)


def bn_relu_mean(h3d, scale, shift):
    B, N, C = h3d.shape
    out = pl.pallas_call(
        _bn_relu_mean_kernel,
        out_shape=jax.ShapeDtypeStruct((B, 1, C), jnp.float32),
        grid=(B,),
        in_specs=[pl.BlockSpec((1, N, C), lambda b: (b, 0, 0)),
                  pl.BlockSpec((1, C), lambda b: (0, 0)),
                  pl.BlockSpec((1, C), lambda b: (0, 0))],
        out_specs=pl.BlockSpec((1, 1, C), lambda b: (b, 0, 0)),
        compiler_params=pltpu.CompilerParams(
            dimension_semantics=("parallel",),
            vmem_limit_bytes=_VMEM_LIMIT_BYTES),
    )(h3d, scale, shift)
    return out.reshape(B, C)


# ---------------------------------------------------------------------------
# Kernel 3: pairwise euclidean distances, Gram-matrix form, one batch per step.
# ---------------------------------------------------------------------------
def _pdist_kernel(x_ref, o_ref):
    x = x_ref[0]                                                 # (K, C)
    sq = jnp.sum(x * x, axis=-1, keepdims=True)                  # (K, 1)
    gram = jnp.dot(x, x.T, preferred_element_type=jnp.float32)   # (K, K)
    d2 = sq + jnp.transpose(sq) - 2.0 * gram
    o_ref[0] = jnp.sqrt(jnp.maximum(d2, 0.0))


def pairwise_dist(nodes):
    B, K, C = nodes.shape
    return pl.pallas_call(
        _pdist_kernel,
        out_shape=jax.ShapeDtypeStruct((B, K, K), jnp.float32),
        grid=(B,),
        in_specs=[pl.BlockSpec((1, K, C), lambda b: (b, 0, 0))],
        out_specs=pl.BlockSpec((1, K, K), lambda b: (b, 0, 0)),
        compiler_params=pltpu.CompilerParams(
            dimension_semantics=("parallel",),
            vmem_limit_bytes=_VMEM_LIMIT_BYTES),
    )(nodes)


# ---------------------------------------------------------------------------
# GD forward (glue)
# ---------------------------------------------------------------------------
def gd_forward(feat, params, vfe_nodes):
    # TODO(synk): the resnet50 backbone is not defined in the source snippet;
    # `feat` is taken to be the backbone's (B, N, in_channels) feature output.
    B, N, Cin = feat.shape
    Cout = params["g_w"].shape[0]
    K = vfe_nodes
    M = B * N

    # ---- global LinearBlock: tiled bf16 matmul + BN stats ----
    x2d = feat.reshape(M, Cin).astype(jnp.bfloat16)
    wg = jnp.transpose(params["g_w"]).astype(jnp.bfloat16)        # (Cin, Cout)
    h1, stats1 = _tiled_matmul_stats(x2d, wg, params["g_b"])
    scale1, shift1 = _bn_fold(stats1, M, params["g_gamma"], params["g_beta"])

    # ---- VFE: all K node Linears as ONE matmul; stage-1 BN+ReLU fused into the load
    w_cat = jnp.transpose(params["v_w"], (2, 0, 1)).reshape(Cout, K * Cout)
    w_cat = w_cat.astype(jnp.bfloat16)
    b_cat = params["v_b"].reshape(K * Cout)
    gamma_cat = params["v_gamma"].reshape(K * Cout)
    beta_cat = params["v_beta"].reshape(K * Cout)

    h2, stats2 = _tiled_matmul_stats(h1, w_cat, b_cat, scale=scale1, shift=shift1)
    scale2, shift2 = _bn_fold(stats2, M, gamma_cat, beta_cat)

    # ---- per-node BN + ReLU + mean over N -> basic nodes (B, K, Cout) ----
    basic2d = bn_relu_mean(h2.reshape(B, N, K * Cout), scale2, shift2)
    basic_nodes = basic2d.reshape(B, K, Cout)

    # ---- pairwise euclidean distances (Gram form, per-batch grid) ----
    dists = pairwise_dist(basic_nodes)                            # (B, K, K)

    # Reproduce the PyTorch `i * j` index bug with ONE vectorized scatter
    # (for duplicate targets the last (i, j) in loop order wins, as in the loop).
    slot_to_src = {}
    for i in range(K):
        for j in range(K):
            slot_to_src[i * j] = i * K + j
    slots = sorted(slot_to_src)
    slot_idx = jnp.asarray(slots, dtype=jnp.int32)
    src_idx = jnp.asarray([slot_to_src[s] for s in slots], dtype=jnp.int32)
    d_flat = dists.reshape(B, K * K)
    f_e = jnp.zeros((B, K * K), jnp.float32)
    f_e = f_e.at[:, slot_idx].set(jnp.take(d_flat, src_idx, axis=1))
    f_e = f_e[:, :, None]

    # TODO(synk): dgl.DGLGraph construction / add_edges has no Pallas/JAX
    # equivalent; we return the node & edge feature tensors instead of `g`.
    initial_node = basic_nodes[0]        # g.ndata['feat']
    initial_feature = f_e[0]             # g.edata['feat']
    return basic_nodes, f_e, initial_node, initial_feature


def init_params(key, in_channels, out_channels, vfe_nodes):
    ks = jax.random.split(key, 4)
    # global LinearBlock: Linear(in_channels, out_channels)
    g_w = jax.random.normal(ks[0], (out_channels, in_channels), jnp.float32) * \
        math.sqrt(2.0 / out_channels)
    g_b_bound = 1.0 / math.sqrt(in_channels)
    g_b = jax.random.uniform(ks[1], (out_channels,), jnp.float32,
                             -g_b_bound, g_b_bound)
    # VFE: vfe_nodes x LinearBlock(out_channels, out_channels)
    v_w = jax.random.normal(ks[2], (vfe_nodes, out_channels, out_channels),
                            jnp.float32) * math.sqrt(2.0 / out_channels)
    v_b_bound = 1.0 / math.sqrt(out_channels)
    v_b = jax.random.uniform(ks[3], (vfe_nodes, out_channels), jnp.float32,
                             -v_b_bound, v_b_bound)
    return {
        "g_w": g_w, "g_b": g_b,
        "g_gamma": jnp.ones((out_channels,), jnp.float32),
        "g_beta": jnp.zeros((out_channels,), jnp.float32),
        "v_w": v_w, "v_b": v_b,
        "v_gamma": jnp.ones((vfe_nodes, out_channels), jnp.float32),
        "v_beta": jnp.zeros((vfe_nodes, out_channels), jnp.float32),
    }


if __name__ == "__main__":
    # Small shapes consistent with the module: in the original, in_channels is
    # resnet50's fc input (2048) and out_channels = in_channels // 4.  Here we
    # use in_channels=32 -> out_channels=8, vfe_nodes=4, batch=2, seq=8.
    B, N = 2, 8
    in_channels = 32
    out_channels = in_channels // 4
    vfe_nodes = 4

    key = jax.random.PRNGKey(0)
    k_feat, k_params = jax.random.split(key)
    feat = jax.random.normal(k_feat, (B, N, in_channels), jnp.float32)
    params = init_params(k_params, in_channels, out_channels, vfe_nodes)

    gd_forward_jit = jax.jit(gd_forward, static_argnums=(2,))
    basic_nodes, f_e, initial_node, initial_feature = gd_forward_jit(
        feat, params, vfe_nodes)
    jax.block_until_ready((basic_nodes, f_e, initial_node, initial_feature))

    assert basic_nodes.shape == (B, vfe_nodes, out_channels)
    assert f_e.shape == (B, vfe_nodes * vfe_nodes, 1)
    assert initial_node.shape == (vfe_nodes, out_channels)
    assert initial_feature.shape == (vfe_nodes * vfe_nodes, 1)
    assert bool(jnp.all(jnp.isfinite(basic_nodes))) and bool(jnp.all(jnp.isfinite(f_e)))
    print("KERNEL_OK")
</pallas_src>

<mosaic_0001>
module attributes {stable_mosaic.version = 11 : i64} {
  func.func @_matmul_stats_kernel(%arg0: i32, %arg1: i32, %arg2: memref<16x32xbf16, #tpu.memory_space<vmem>>, %arg3: memref<32x8xbf16, #tpu.memory_space<vmem>>, %arg4: memref<1x8xf32, #tpu.memory_space<vmem>>, %arg5: memref<16x8xf32, #tpu.memory_space<vmem>>, %arg6: memref<1x2x8xf32, #tpu.memory_space<vmem>>, %arg7: memref<16x8xf32, #tpu.memory_space<vmem>>) attributes {dimension_semantics = [#tpu.dimension_semantics<parallel>, #tpu.dimension_semantics<arbitrary>], iteration_bounds = array<i64: 1, 1>, scalar_prefetch = 0 : i64, scratch_operands = 1 : i64, tpu.core_type = #tpu.core_type<tc>, window_params = [{transform_indices = @transform_0, window_bounds = array<i64: 16, 32>}, {transform_indices = @transform_1, window_bounds = array<i64: 32, 8>}, {pipeline_mode = #tpu.pipeline_mode<synchronous>, transform_indices = @transform_2, window_bounds = array<i64: 1, 8>}, {transform_indices = @transform_3, window_bounds = array<i64: 16, 8>}, {transform_indices = @transform_4, window_bounds = array<i64: 1, 2, 8>}]} {
    %c0_i32 = arith.constant 0 : i32
    %0 = arith.cmpi eq, %arg1, %c0_i32 : i32
    %1 = arith.extui %0 : i1 to i32
    %c0_i32_0 = arith.constant 0 : i32
    %2 = arith.cmpi ne, %1, %c0_i32_0 : i32
    scf.if %2 {
      %cst_10 = arith.constant 0.000000e+00 : f32
      %12 = vector.broadcast %cst_10 : f32 to vector<16x8xf32>
      %c0_11 = arith.constant 0 : index
      %c0_12 = arith.constant 0 : index
      %13 = vector.load %arg7[%c0_11, %c0_12] : memref<16x8xf32, #tpu.memory_space<vmem>>, vector<16x8xf32>
      tpu.vector_store %arg7[%c0_11, %c0_12], %12 {strides = array<i32>} : memref<16x8xf32, #tpu.memory_space<vmem>>, vector<16x8xf32>,
    } else {
    }
    %c0 = arith.constant 0 : index
    %c0_1 = arith.constant 0 : index
    %3 = vector.load %arg7[%c0, %c0_1] : memref<16x8xf32, #tpu.memory_space<vmem>>, vector<16x8xf32>
    %c0_2 = arith.constant 0 : index
    %c0_3 = arith.constant 0 : index
    %4 = vector.load %arg2[%c0_2, %c0_3] : memref<16x32xbf16, #tpu.memory_space<vmem>>, vector<16x32xbf16>
    %c0_4 = arith.constant 0 : index
    %c0_5 = arith.constant 0 : index
    %5 = vector.load %arg3[%c0_4, %c0_5] : memref<32x8xbf16, #tpu.memory_space<vmem>>, vector<32x8xbf16>
    %cst = arith.constant dense<0.000000e+00> : vector<16x8xf32>
    %6 = tpu.matmul %4, %5, %cst {dimension_numbers = #tpu.dot_dimension_numbers<[1], [0], [0], [1], [0, 0, 1, 1], [], []>} : vector<16x32xbf16>, vector<32x8xbf16>, vector<16x8xf32> -> vector<16x8xf32>
    %7 = arith.addf %3, %6 : vector<16x8xf32>
    %c0_6 = arith.constant 0 : index
    %c0_7 = arith.constant 0 : index
    %8 = vector.load %arg7[%c0_6, %c0_7] : memref<16x8xf32, #tpu.memory_space<vmem>>, vector<16x8xf32>
    tpu.vector_store %arg7[%c0_6, %c0_7], %7 {strides = array<i32>} : memref<16x8xf32, #tpu.memory_space<vmem>>, vector<16x8xf32>,
    %c0_i32_8 = arith.constant 0 : i32
    %9 = arith.cmpi eq, %arg1, %c0_i32_8 : i32
    %10 = arith.extui %9 : i1 to i32
    %c0_i32_9 = arith.constant 0 : i32
    %11 = arith.cmpi ne, %10, %c0_i32_9 : i32
    scf.if %11 {
      %c0_10 = arith.constant 0 : index
      %c0_11 = arith.constant 0 : index
      %12 = vector.load %arg7[%c0_10, %c0_11] : memref<16x8xf32, #tpu.memory_space<vmem>>, vector<16x8xf32>
      %c0_12 = arith.constant 0 : index
      %c0_13 = arith.constant 0 : index
      %13 = vector.load %arg4[%c0_12, %c0_13] : memref<1x8xf32, #tpu.memory_space<vmem>>, vector<1x8xf32>
      %14 = vector.broadcast %13 : vector<1x8xf32> to vector<16x8xf32>
      %15 = arith.addf %12, %14 : vector<16x8xf32>
      %c0_14 = arith.constant 0 : index
      %c0_15 = arith.constant 0 : index
      %16 = vector.load %arg5[%c0_14, %c0_15] : memref<16x8xf32, #tpu.memory_space<vmem>>, vector<16x8xf32>
      tpu.vector_store %arg5[%c0_14, %c0_15], %15 {strides = array<i32>} : memref<16x8xf32, #tpu.memory_space<vmem>>, vector<16x8xf32>,
      %cst_16 = arith.constant dense<0.000000e+00> : vector<8xf32>
      %17 = vector.multi_reduction <add>, %15, %cst_16 [0] : vector<16x8xf32> to vector<8xf32>
      %18 = vector.shape_cast %17 : vector<8xf32> to vector<1x8xf32>
      %19 = arith.mulf %15, %15 : vector<16x8xf32>
      %cst_17 = arith.constant dense<0.000000e+00> : vector<8xf32>
      %20 = vector.multi_reduction <add>, %19, %cst_17 [0] : vector<16x8xf32> to vector<8xf32>
      %21 = vector.shape_cast %20 : vector<8xf32> to vector<1x8xf32>
      %22 = tpu.concatenate %18, %21 in 0 : vector<1x8xf32>, vector<1x8xf32> -> vector<2x8xf32>
      %c0_18 = arith.constant 0 : index
      %c0_19 = arith.constant 0 : index
      %c0_20 = arith.constant 0 : index
      %23 = vector.load %arg6[%c0_18, %c0_19, %c0_20] : memref<1x2x8xf32, #tpu.memory_space<vmem>>, vector<1x2x8xf32>
      %24 = vector.shape_cast %23 : vector<1x2x8xf32> to vector<2x8xf32>
      %25 = vector.shape_cast %22 : vector<2x8xf32> to vector<1x2x8xf32>
      tpu.vector_store %arg6[%c0_18, %c0_19, %c0_20], %25 {strides = array<i32>} : memref<1x2x8xf32, #tpu.memory_space<vmem>>, vector<1x2x8xf32>,
    } else {
    }
    return
  }
  func.func @transform_0(%arg0: i32, %arg1: i32) -> (i32, i32) {
    %c0_i32 = arith.constant 0 : i32
    return %arg0, %arg1 : i32, i32
  }
  func.func @transform_1(%arg0: i32, %arg1: i32) -> (i32, i32) {
    %c0_i32 = arith.constant 0 : i32
    %c0_i32_0 = arith.constant 0 : i32
    return %arg1, %c0_i32 : i32, i32
  }
  func.func @transform_2(%arg0: i32, %arg1: i32) -> (i32, i32) {
    %c0_i32 = arith.constant 0 : i32
    %c0_i32_0 = arith.constant 0 : i32
    %c0_i32_1 = arith.constant 0 : i32
    return %c0_i32, %c0_i32_0 : i32, i32
  }
  func.func @transform_3(%arg0: i32, %arg1: i32) -> (i32, i32) {
    %c0_i32 = arith.constant 0 : i32
    %c0_i32_0 = arith.constant 0 : i32
    return %arg0, %c0_i32 : i32, i32
  }
  func.func @transform_4(%arg0: i32, %arg1: i32) -> (i32, i32, i32) {
    %c0_i32 = arith.constant 0 : i32
    %c0_i32_0 = arith.constant 0 : i32
    %c0_i32_1 = arith.constant 0 : i32
    return %arg0, %c0_i32, %c0_i32_0 : i32, i32, i32
  }
}

module attributes {stable_mosaic.version = 11 : i64} {
  func.func @_bnrelu_matmul_stats_kernel(%arg0: i32, %arg1: i32, %arg2: memref<16x8xf32, #tpu.memory_space<vmem>>, %arg3: memref<1x8xf32, #tpu.memory_space<vmem>>, %arg4: memref<1x8xf32, #tpu.memory_space<vmem>>, %arg5: memref<8x32xbf16, #tpu.memory_space<vmem>>, %arg6: memref<1x32xf32, #tpu.memory_space<vmem>>, %arg7: memref<16x32xf32, #tpu.memory_space<vmem>>, %arg8: memref<1x2x32xf32, #tpu.memory_space<vmem>>, %arg9: memref<16x32xf32, #tpu.memory_space<vmem>>) attributes {dimension_semantics = [#tpu.dimension_semantics<parallel>, #tpu.dimension_semantics<arbitrary>], iteration_bounds = array<i64: 1, 1>, scalar_prefetch = 0 : i64, scratch_operands = 1 : i64, tpu.core_type = #tpu.core_type<tc>, window_params = [{transform_indices = @transform_0, window_bounds = array<i64: 16, 8>}, {transform_indices = @transform_1, window_bounds = array<i64: 1, 8>}, {transform_indices = @transform_2, window_bounds = array<i64: 1, 8>}, {transform_indices = @transform_3, window_bounds = array<i64: 8, 32>}, {pipeline_mode = #tpu.pipeline_mode<synchronous>, transform_indices = @transform_4, window_bounds = array<i64: 1, 32>}, {transform_indices = @transform_5, window_bounds = array<i64: 16, 32>}, {transform_indices = @transform_6, window_bounds = array<i64: 1, 2, 32>}]} {
    %c0_i32 = arith.constant 0 : i32
    %0 = arith.cmpi eq, %arg1, %c0_i32 : i32
    %1 = arith.extui %0 : i1 to i32
    %c0_i32_0 = arith.constant 0 : i32
    %2 = arith.cmpi ne, %1, %c0_i32_0 : i32
    scf.if %2 {
      %cst_15 = arith.constant 0.000000e+00 : f32
      %21 = vector.broadcast %cst_15 : f32 to vector<16x32xf32>
      %c0_16 = arith.constant 0 : index
      %c0_17 = arith.constant 0 : index
      %22 = vector.load %arg9[%c0_16, %c0_17] : memref<16x32xf32, #tpu.memory_space<vmem>>, vector<16x32xf32>
      tpu.vector_store %arg9[%c0_16, %c0_17], %21 {strides = array<i32>} : memref<16x32xf32, #tpu.memory_space<vmem>>, vector<16x32xf32>,
    } else {
    }
    %c0 = arith.constant 0 : index
    %c0_1 = arith.constant 0 : index
    %3 = vector.load %arg2[%c0, %c0_1] : memref<16x8xf32, #tpu.memory_space<vmem>>, vector<16x8xf32>
    %c0_2 = arith.constant 0 : index
    %c0_3 = arith.constant 0 : index
    %4 = vector.load %arg3[%c0_2, %c0_3] : memref<1x8xf32, #tpu.memory_space<vmem>>, vector<1x8xf32>
    %5 = vector.broadcast %4 : vector<1x8xf32> to vector<16x8xf32>
    %6 = arith.mulf %3, %5 : vector<16x8xf32>
    %c0_4 = arith.constant 0 : index
    %c0_5 = arith.constant 0 : index
    %7 = vector.load %arg4[%c0_4, %c0_5] : memref<1x8xf32, #tpu.memory_space<vmem>>, vector<1x8xf32>
    %8 = vector.broadcast %7 : vector<1x8xf32> to vector<16x8xf32>
    %9 = arith.addf %6, %8 : vector<16x8xf32>
    %cst = arith.constant 0.000000e+00 : f32
    %10 = vector.broadcast %cst : f32 to vector<16x8xf32>
    %11 = arith.maximumf %9, %10 : vector<16x8xf32>
    %c0_6 = arith.constant 0 : index
    %c0_7 = arith.constant 0 : index
    %12 = vector.load %arg9[%c0_6, %c0_7] : memref<16x32xf32, #tpu.memory_space<vmem>>, vector<16x32xf32>
    %13 = arith.truncf %11 : vector<16x8xf32> to vector<16x8xbf16>
    %c0_8 = arith.constant 0 : index
    %c0_9 = arith.constant 0 : index
    %14 = vector.load %arg5[%c0_8, %c0_9] : memref<8x32xbf16, #tpu.memory_space<vmem>>, vector<8x32xbf16>
    %cst_10 = arith.constant dense<0.000000e+00> : vector<16x32xf32>
    %15 = tpu.matmul %13, %14, %cst_10 {dimension_numbers = #tpu.dot_dimension_numbers<[1], [0], [0], [1], [0, 0, 1, 1], [], []>} : vector<16x8xbf16>, vector<8x32xbf16>, vector<16x32xf32> -> vector<16x32xf32>
    %16 = arith.addf %12, %15 : vector<16x32xf32>
    %c0_11 = arith.constant 0 : index
    %c0_12 = arith.constant 0 : index
    %17 = vector.load %arg9[%c0_11, %c0_12] : memref<16x32xf32, #tpu.memory_space<vmem>>, vector<16x32xf32>
    tpu.vector_store %arg9[%c0_11, %c0_12], %16 {strides = array<i32>} : memref<16x32xf32, #tpu.memory_space<vmem>>, vector<16x32xf32>,
    %c0_i32_13 = arith.constant 0 : i32
    %18 = arith.cmpi eq, %arg1, %c0_i32_13 : i32
    %19 = arith.extui %18 : i1 to i32
    %c0_i32_14 = arith.constant 0 : i32
    %20 = arith.cmpi ne, %19, %c0_i32_14 : i32
    scf.if %20 {
      %c0_15 = arith.constant 0 : index
      %c0_16 = arith.constant 0 : index
      %21 = vector.load %arg9[%c0_15, %c0_16] : memref<16x32xf32, #tpu.memory_space<vmem>>, vector<16x32xf32>
      %c0_17 = arith.constant 0 : index
      %c0_18 = arith.constant 0 : index
      %22 = vector.load %arg6[%c0_17, %c0_18] : memref<1x32xf32, #tpu.memory_space<vmem>>, vector<1x32xf32>
      %23 = vector.broadcast %22 : vector<1x32xf32> to vector<16x32xf32>
      %24 = arith.addf %21, %23 : vector<16x32xf32>
      %c0_19 = arith.constant 0 : index
      %c0_20 = arith.constant 0 : index
      %25 = vector.load %arg7[%c0_19, %c0_20] : memref<16x32xf32, #tpu.memory_space<vmem>>, vector<16x32xf32>
      tpu.vector_store %arg7[%c0_19, %c0_20], %24 {strides = array<i32>} : memref<16x32xf32, #tpu.memory_space<vmem>>, vector<16x32xf32>,
      %cst_21 = arith.constant dense<0.000000e+00> : vector<32xf32>
      %26 = vector.multi_reduction <add>, %24, %cst_21 [0] : vector<16x32xf32> to vector<32xf32>
      %27 = vector.shape_cast %26 : vector<32xf32> to vector<1x32xf32>
      %28 = arith.mulf %24, %24 : vector<16x32xf32>
      %cst_22 = arith.constant dense<0.000000e+00> : vector<32xf32>
      %29 = vector.multi_reduction <add>, %28, %cst_22 [0] : vector<16x32xf32> to vector<32xf32>
      %30 = vector.shape_cast %29 : vector<32xf32> to vector<1x32xf32>
      %31 = tpu.concatenate %27, %30 in 0 : vector<1x32xf32>, vector<1x32xf32> -> vector<2x32xf32>
      %c0_23 = arith.constant 0 : index
      %c0_24 = arith.constant 0 : index
      %c0_25 = arith.constant 0 : index
      %32 = vector.load %arg8[%c0_23, %c0_24, %c0_25] : memref<1x2x32xf32, #tpu.memory_space<vmem>>, vector<1x2x32xf32>
      %33 = vector.shape_cast %32 : vector<1x2x32xf32> to vector<2x32xf32>
      %34 = vector.shape_cast %31 : vector<2x32xf32> to vector<1x2x32xf32>
      tpu.vector_store %arg8[%c0_23, %c0_24, %c0_25], %34 {strides = array<i32>} : memref<1x2x32xf32, #tpu.memory_space<vmem>>, vector<1x2x32xf32>,
    } else {
    }
    return
  }
  func.func @transform_0(%arg0: i32, %arg1: i32) -> (i32, i32) {
    %c0_i32 = arith.constant 0 : i32
    return %arg0, %arg1 : i32, i32
  }
  func.func @transform_1(%arg0: i32, %arg1: i32) -> (i32, i32) {
    %c0_i32 = arith.constant 0 : i32
    %c0_i32_0 = arith.constant 0 : i32
    return %c0_i32, %arg1 : i32, i32
  }
  func.func @transform_2(%arg0: i32, %arg1: i32) -> (i32, i32) {
    %c0_i32 = arith.constant 0 : i32
    %c0_i32_0 = arith.constant 0 : i32
    return %c0_i32, %arg1 : i32, i32
  }
  func.func @transform_3(%arg0: i32, %arg1: i32) -> (i32, i32) {
    %c0_i32 = arith.constant 0 : i32
    %c0_i32_0 = arith.constant 0 : i32
    return %arg1, %c0_i32 : i32, i32
  }
  func.func @transform_4(%arg0: i32, %arg1: i32) -> (i32, i32) {
    %c0_i32 = arith.constant 0 : i32
    %c0_i32_0 = arith.constant 0 : i32
    %c0_i32_1 = arith.constant 0 : i32
    return %c0_i32, %c0_i32_0 : i32, i32
  }
  func.func @transform_5(%arg0: i32, %arg1: i32) -> (i32, i32) {
    %c0_i32 = arith.constant 0 : i32
    %c0_i32_0 = arith.constant 0 : i32
    return %arg0, %c0_i32 : i32, i32
  }
  func.func @transform_6(%arg0: i32, %arg1: i32) -> (i32, i32, i32) {
    %c0_i32 = arith.constant 0 : i32
    %c0_i32_0 = arith.constant 0 : i32
    %c0_i32_1 = arith.constant 0 : i32
    return %arg0, %c0_i32, %c0_i32_0 : i32, i32, i32
  }
}

module attributes {stable_mosaic.version = 11 : i64} {
  func.func @_bn_relu_mean_kernel(%arg0: i32, %arg1: memref<1x8x32xf32, #tpu.memory_space<vmem>>, %arg2: memref<1x32xf32, #tpu.memory_space<vmem>>, %arg3: memref<1x32xf32, #tpu.memory_space<vmem>>, %arg4: memref<1x1x32xf32, #tpu.memory_space<vmem>>) attributes {dimension_semantics = [#tpu.dimension_semantics<parallel>], iteration_bounds = array<i64: 2>, scalar_prefetch = 0 : i64, scratch_operands = 0 : i64, tpu.core_type = #tpu.core_type<tc>, window_params = [{transform_indices = @transform_0, window_bounds = array<i64: 1, 8, 32>}, {pipeline_mode = #tpu.pipeline_mode<synchronous>, transform_indices = @transform_1, window_bounds = array<i64: 1, 32>}, {pipeline_mode = #tpu.pipeline_mode<synchronous>, transform_indices = @transform_2, window_bounds = array<i64: 1, 32>}, {transform_indices = @transform_3, window_bounds = array<i64: 1, 1, 32>}]} {
    %c0 = arith.constant 0 : index
    %c0_0 = arith.constant 0 : index
    %c0_1 = arith.constant 0 : index
    %0 = vector.load %arg1[%c0, %c0_0, %c0_1] : memref<1x8x32xf32, #tpu.memory_space<vmem>>, vector<1x8x32xf32>
    %1 = vector.shape_cast %0 : vector<1x8x32xf32> to vector<8x32xf32>
    %c0_2 = arith.constant 0 : index
    %c0_3 = arith.constant 0 : index
    %2 = vector.load %arg2[%c0_2, %c0_3] : memref<1x32xf32, #tpu.memory_space<vmem>>, vector<1x32xf32>
    %3 = vector.broadcast %2 : vector<1x32xf32> to vector<8x32xf32>
    %4 = arith.mulf %1, %3 : vector<8x32xf32>
    %c0_4 = arith.constant 0 : index
    %c0_5 = arith.constant 0 : index
    %5 = vector.load %arg3[%c0_4, %c0_5] : memref<1x32xf32, #tpu.memory_space<vmem>>, vector<1x32xf32>
    %6 = vector.broadcast %5 : vector<1x32xf32> to vector<8x32xf32>
    %7 = arith.addf %4, %6 : vector<8x32xf32>
    %cst = arith.constant 0.000000e+00 : f32
    %8 = vector.broadcast %cst : f32 to vector<8x32xf32>
    %9 = arith.maximumf %7, %8 : vector<8x32xf32>
    %cst_6 = arith.constant dense<0.000000e+00> : vector<32xf32>
    %10 = vector.multi_reduction <add>, %9, %cst_6 [0] : vector<8x32xf32> to vector<32xf32>
    %11 = vector.shape_cast %10 : vector<32xf32> to vector<1x32xf32>
    %cst_7 = arith.constant 8.000000e+00 : f32
    %12 = vector.broadcast %cst_7 : f32 to vector<1x32xf32>
    %13 = arith.divf %11, %12 : vector<1x32xf32>
    %c0_8 = arith.constant 0 : index
    %c0_9 = arith.constant 0 : index
    %c0_10 = arith.constant 0 : index
    %14 = vector.load %arg4[%c0_8, %c0_9, %c0_10] : memref<1x1x32xf32, #tpu.memory_space<vmem>>, vector<1x1x32xf32>
    %15 = vector.shape_cast %14 : vector<1x1x32xf32> to vector<1x32xf32>
    %16 = vector.shape_cast %13 : vector<1x32xf32> to vector<1x1x32xf32>
    tpu.vector_store %arg4[%c0_8, %c0_9, %c0_10], %16 {strides = array<i32>} : memref<1x1x32xf32, #tpu.memory_space<vmem>>, vector<1x1x32xf32>,
    return
  }
  func.func @transform_0(%arg0: i32) -> (i32, i32, i32) {
    %c0_i32 = arith.constant 0 : i32
    %c0_i32_0 = arith.constant 0 : i32
    %c0_i32_1 = arith.constant 0 : i32
    return %arg0, %c0_i32, %c0_i32_0 : i32, i32, i32
  }
  func.func @transform_1(%arg0: i32) -> (i32, i32) {
    %c0_i32 = arith.constant 0 : i32
    %c0_i32_0 = arith.constant 0 : i32
    %c0_i32_1 = arith.constant 0 : i32
    return %c0_i32, %c0_i32_0 : i32, i32
  }
  func.func @transform_2(%arg0: i32) -> (i32, i32) {
    %c0_i32 = arith.constant 0 : i32
    %c0_i32_0 = arith.constant 0 : i32
    %c0_i32_1 = arith.constant 0 : i32
    return %c0_i32, %c0_i32_0 : i32, i32
  }
  func.func @transform_3(%arg0: i32) -> (i32, i32, i32) {
    %c0_i32 = arith.constant 0 : i32
    %c0_i32_0 = arith.constant 0 : i32
    %c0_i32_1 = arith.constant 0 : i32
    return %arg0, %c0_i32, %c0_i32_0 : i32, i32, i32
  }
}

module attributes {stable_mosaic.version = 11 : i64} {
  func.func @_pdist_kernel(%arg0: i32, %arg1: memref<1x4x8xf32, #tpu.memory_space<vmem>>, %arg2: memref<1x4x4xf32, #tpu.memory_space<vmem>>) attributes {dimension_semantics = [#tpu.dimension_semantics<parallel>], iteration_bounds = array<i64: 2>, scalar_prefetch = 0 : i64, scratch_operands = 0 : i64, tpu.core_type = #tpu.core_type<tc>, window_params = [{transform_indices = @transform_0, window_bounds = array<i64: 1, 4, 8>}, {transform_indices = @transform_1, window_bounds = array<i64: 1, 4, 4>}]} {
    %c0 = arith.constant 0 : index
    %c0_0 = arith.constant 0 : index
    %c0_1 = arith.constant 0 : index
    %0 = vector.load %arg1[%c0, %c0_0, %c0_1] : memref<1x4x8xf32, #tpu.memory_space<vmem>>, vector<1x4x8xf32>
    %1 = vector.shape_cast %0 : vector<1x4x8xf32> to vector<4x8xf32>
    %2 = arith.mulf %1, %1 : vector<4x8xf32>
    %cst = arith.constant dense<0.000000e+00> : vector<4xf32>
    %3 = vector.multi_reduction <add>, %2, %cst [1] : vector<4x8xf32> to vector<4xf32>
    %4 = vector.shape_cast %3 : vector<4xf32> to vector<4x1xf32>
    %5 = tpu.transpose %1, [1, 0] : vector<4x8xf32> -> vector<8x4xf32>
    %cst_2 = arith.constant dense<0.000000e+00> : vector<4x4xf32>
    %6 = tpu.matmul %1, %5, %cst_2 {dimension_numbers = #tpu.dot_dimension_numbers<[1], [0], [0], [1], [0, 0, 1, 1], [], []>} : vector<4x8xf32>, vector<8x4xf32>, vector<4x4xf32> -> vector<4x4xf32>
    %7 = tpu.transpose %4, [1, 0] : vector<4x1xf32> -> vector<1x4xf32>
    %8 = vector.broadcast %4 : vector<4x1xf32> to vector<4x4xf32>
    %9 = vector.broadcast %7 : vector<1x4xf32> to vector<4x4xf32>
    %10 = arith.addf %8, %9 : vector<4x4xf32>
    %cst_3 = arith.constant 2.000000e+00 : f32
    %11 = vector.broadcast %cst_3 : f32 to vector<4x4xf32>
    %12 = arith.mulf %11, %6 : vector<4x4xf32>
    %13 = arith.subf %10, %12 : vector<4x4xf32>
    %cst_4 = arith.constant 0.000000e+00 : f32
    %14 = vector.broadcast %cst_4 : f32 to vector<4x4xf32>
    %15 = arith.maximumf %13, %14 : vector<4x4xf32>
    %16 = math.sqrt %15 : vector<4x4xf32>
    %c0_5 = arith.constant 0 : index
    %c0_6 = arith.constant 0 : index
    %c0_7 = arith.constant 0 : index
    %17 = vector.load %arg2[%c0_5, %c0_6, %c0_7] : memref<1x4x4xf32, #tpu.memory_space<vmem>>, vector<1x4x4xf32>
    %18 = vector.shape_cast %17 : vector<1x4x4xf32> to vector<4x4xf32>
    %19 = vector.shape_cast %16 : vector<4x4xf32> to vector<1x4x4xf32>
    tpu.vector_store %arg2[%c0_5, %c0_6, %c0_7], %19 {strides = array<i32>} : memref<1x4x4xf32, #tpu.memory_space<vmem>>, vector<1x4x4xf32>,
    return
  }
  func.func @transform_0(%arg0: i32) -> (i32, i32, i32) {
    %c0_i32 = arith.constant 0 : i32
    %c0_i32_0 = arith.constant 0 : i32
    %c0_i32_1 = arith.constant 0 : i32
    return %arg0, %c0_i32, %c0_i32_0 : i32, i32, i32
  }
  func.func @transform_1(%arg0: i32) -> (i32, i32, i32) {
    %c0_i32 = arith.constant 0 : i32
    %c0_i32_0 = arith.constant 0 : i32
    %c0_i32_1 = arith.constant 0 : i32
    return %arg0, %c0_i32, %c0_i32_0 : i32, i32, i32
  }
}

</mosaic_0001>

<bundles_post_ra>
// kernel: gd_forward.4
= control target key start
LH: loop header
LB: loop body
LE: loop exit
PB: predicated region body
PF: predicated region fallthrough
CT: control target
= control target key end

     0   :  { %vm21_vm0 = vcmask 64512   ;;  %v168_v0 = vmov 0.0   ;;  %vm169_vm1 = vmmov 0   ;;  %vm49_vm2 = vcmask 261120   ;;  %s226_s1 = inlined_call_operand.vmem [shape: bf16[32,8], index: 1, kind: input, shape index: {}]   ;;  %s227_s0 = inlined_call_operand.vmem [shape: bf16[16,32], index: 0, kind: input, shape index: {}]   ;;  %s228_s2 = inlined_call_operand.vmem [shape: f32[1,8], index: 2, kind: input, shape index: {}]   ;;  %s229_s3 = inlined_call_operand.vmem [shape: f32[16,8], index: 3, kind: output, shape index: {0}]   ;;  %s230_s4 = inlined_call_operand.vmem [shape: f32[1,2,8], index: 4, kind: output, shape index: {1}]  }
   0x1   :  { %155 = vmatprep.subr.bf16.mxu0 %v168_v0  ;;  %v165_v1 = vld [vmem:[%s226_s1] sm:$0xff]   ;;  %159 = vmatprep.mubr.msk.bf16.mxu0 %vm169_vm1, %v168_v0  ;;  %22 = vst.msk [vmem:[#allocation2] sm:$0xff] %vm21_vm0, %v168_v0  ;;  %23 = vst.msk [vmem:[#allocation2 + $0x8] sm:$0xff] %vm21_vm0, %v168_v0  ;;  %v166_v2 = vld [vmem:[%s226_s1 + $0x8] sm:$0xff]   ;;  %vm135_vm3 = vcmask 1040384   ;;  %vm137_vm4 = vcmask 58368  }
   0x2   :  { %156 = vmatpush3.bf16.msra.mxu0 %v165_v1  ;;  %v167_v3 = vld [vmem:[%s227_s0] sm:$0xff]  }
   0x3   :  { %157 = vmatprep.subr.bf16.mxu0 %v168_v0  ;;  %v151_v12 = vld [vmem:[%s228_s2] ss:$0 sm:$0xff] }
   0x6   :  { %158 = vmatpush3.bf16.msra.mxu0 %v166_v2 }
   0x8   :  { %v24_v4 = vld [vmem:[#allocation2] sm:$0xff]  ;;  %v25_v6 = vld [vmem:[#allocation2 + $0x8] sm:$0xff] }
   0x9   :  { %160 = vmatmul.mubr.msk.bf16.vlgmr.msra.gmra.mrb[0].mxu0 %vm49_vm2, %v167_v3 }
  0xdc   :  { %v87_v5 = vpop.f32.mrb[0].mxu0 }
  0xdd   :  { %v94_v7 = vadd.f32 %v87_v5, %v24_v4  ;;  %v161_v8 = vpop.f32.mrb[1].mxu0 }
  0xde   :  { %v90_v9 = vpop.f32.mrb[2].mxu0 }
  0xdf   :  { %97 = vst.msk [vmem:[#allocation2] sm:$0xff] %vm21_vm0, %v94_v7  ;;  %v95_v10 = vadd.f32 %v90_v9, %v25_v6  ;;  %v162_v11 = vpop.f32.mrb[3].mxu0 }
  0xe1   :  { %98 = vst.msk [vmem:[#allocation2 + $0x8] sm:$0xff] %vm21_vm0, %v95_v10 }
  0xe6   :  { %v102_v13 = vld [vmem:[#allocation2] sm:$0xff] }
  0xe7   :  { %v111_v14 = vadd.f32 %v151_v12, %v102_v13 }
  0xe8   :  { %v103_v15 = vld [vmem:[#allocation2 + $0x8] sm:$0xff] }
  0xe9   :  { %113 = vst.msk [vmem:[%s229_s3] sm:$0xff] %vm21_vm0, %v111_v14  ;;  %v124_v16 = vmul.f32 %v111_v14, %v111_v14  ;;  %v112_v17 = vadd.f32 %v151_v12, %v103_v15  ;;  %v115_v18 = vsel %vm21_vm0, %v111_v14, 0.0 }
  0xeb   :  { %114 = vst.msk [vmem:[%s229_s3 + $0x8] sm:$0xff] %vm21_vm0, %v112_v17  ;;  %v116_v19 = vsel %vm21_vm0, %v112_v17, 0.0  ;;  %v125_v20 = vmul.f32 %v112_v17, %v112_v17  ;;  %v126_v22 = vsel %vm21_vm0, %v124_v16, 0.0 }
  0xec   :  { %v117_v21 = vadd.f32 %v116_v19, %v115_v18 }
  0xed   :  { %v127_v23 = vsel %vm21_vm0, %v125_v20, 0.0 }
  0xee   :  { %v118_v24 = vrot.slane %v117_v21, 4  ;;  %v128_v25 = vadd.f32 %v127_v23, %v126_v22 }
  0xf0   :  { %v119_v26 = vadd.f32 %v118_v24, %v117_v21  ;;  %v129_v27 = vrot.slane %v128_v25, 4 }
  0xf2   :  { %v120_v28 = vrot.slane %v119_v26, 2  ;;  %v130_v29 = vadd.f32 %v129_v27, %v128_v25 }
  0xf4   :  { %v121_v30 = vadd.f32 %v120_v28, %v119_v26  ;;  %v131_v31 = vrot.slane %v130_v29, 2 }
  0xf6   :  { %v122_v32 = vrot.slane %v121_v30, 1  ;;  %v132_v33 = vadd.f32 %v131_v31, %v130_v29 }
  0xf8   :  { %v133_v34 = vrot.slane %v132_v33, 1  ;;  %v123_v35 = vadd.f32 %v122_v32, %v121_v30 }
  0xfa   :  { %v134_v36 = vadd.f32 %v133_v34, %v132_v33 }
  0xfc   :  { %v136_v37 = vsel %vm135_vm3, %v123_v35, %v134_v36 }
  0xfd   :  { %138 = vst.msk [vmem:[%s230_s4] sm:$0x3] %vm137_vm4, %v136_v37 }

// kernel: gd_forward.6
= control target key start
LH: loop header
LB: loop body
LE: loop exit
PB: predicated region body
PF: predicated region fallthrough
CT: control target
= control target key end

     0   :  { %s287_s12 = smov 0   ;;  %s310_s0 = inlined_call_operand.vmem [shape: f32[2,8,32], index: 0, kind: input, shape index: {}]   ;;  %s311_s1 = inlined_call_operand.vmem [shape: f32[1,32], index: 1, kind: input, shape index: {}]   ;;  %s312_s2 = inlined_call_operand.vmem [shape: f32[1,32], index: 2, kind: input, shape index: {}]   ;;  %s313_s3 = inlined_call_operand.vmem [shape: f32[2,1,32], index: 3, kind: output, shape index: {}]  }
   0x1 LB: > { %s241_s13 = sadd.s32 4294967295, %s265_s12   ;;  %p245_p0 = scmp.ge.s32.totalorder %s265_s12, 1  ;;  %s265_s12 = sphi %s287_s12, %s13_s12  }
   0x2   : > { %p136_p1 = scmp.lt.s32.totalorder %s265_s12, 3 }
   0x4   : > { %p137_p2 = pnand %p245_p0, %p136_p1 }
   0x5   : > { %p157_p3 = scmp.lt.s32.totalorder (!%p137_p2), %s241_s13, 1  ;;  %v247_v0 = vld [vmem:[%s311_s1] ss:$0 sm:$0xff] (!%p137_p2)  ;;  %vm182_vm0 = vcmask (!%p137_p2), 261120   ;;  %vm192_vm1 = vcmask (!%p137_p2), 253952  }
   0x6   : > { %140 = sbr.rel (%p137_p2) target bundleno = 39 (0x27), region = 32  ;;  %v248_v2 = vld [vmem:[%s312_s2] ss:$0 sm:$0xff] (!%p137_p2) }
   0xd   : > { %s315_s13 = smov (!%p157_p3, %s241_s13), 1 }
   0xe   : > { %s246_s14 = sshll.u32 %s315_s13, 3  ;;  %s163_s24 = scalar_lea.vmem %s313_s3, %s315_s13 }
   0xf   : > { %s160_s19 = scalar_lea.vmem %s310_s0, %s246_s14 }
  0x10   : > { %v164_v1 = vld [vmem:[%s160_s19] sm:$0xff] }
  0x11   : > { %v172_v3 = vmul.f32 %v247_v0, %v164_v1 }
  0x13   : > { %v180_v4 = vadd.f32 %v248_v2, %v172_v3 }
  0x15   : > { %v181_v5 = vmax.f32 %v180_v4, 0.0 }
  0x17   : > { %v183_v6 = vsel %vm182_vm0, %v181_v5, 0.0 }
  0x18   : > { %v184_v7 = vrot.slane %v183_v6, 4 }
  0x1a   : > { %v185_v8 = vadd.f32 %v184_v7, %v183_v6 }
  0x1c   : > { %v186_v9 = vrot.slane %v185_v8, 2 }
  0x1e   : > { %v187_v10 = vadd.f32 %v186_v9, %v185_v8 }
  0x20   : > { %v188_v11 = vrot.slane %v187_v10, 1 }
  0x22   : > { %v189_v12 = vadd.f32 %v188_v11, %v187_v10 }
  0x24   : > { %v191_v13 = vmul.f32 0.125, %v189_v12 }
  0x26   : > { %193 = vst.msk [vmem:[%s163_s24] sm:$0x1] %vm192_vm1, %v191_v13 }
  0x27 PF: > { %s13_s12 = sadd.s32 1, %s265_s12  }
  0x28   : > { %p10_p4 = scmp.ge.s32.totalorder %s13_s12, 4  }
  0x2a   :  { %12 = sbr.rel (!%p10_p4) target bundleno = 1 (0x1), region = 62 }

// kernel: gd_forward.5
= control target key start
LH: loop header
LB: loop body
LE: loop exit
PB: predicated region body
PF: predicated region fallthrough
CT: control target
= control target key end

     0   :  { %vm27_vm0 = vcmask 261120   ;;  %vm60_vm1 = vcmask 1043456   ;;  %v172_v0 = vmov 0.0   ;;  %vm173_vm2 = vmmov 0   ;;  %s246_s3 = inlined_call_operand.vmem [shape: bf16[8,32], index: 3, kind: input, shape index: {}]   ;;  %s247_s0 = inlined_call_operand.vmem [shape: f32[16,8], index: 0, kind: input, shape index: {}]   ;;  %s248_s1 = inlined_call_operand.vmem [shape: f32[1,8], index: 1, kind: input, shape index: {}]   ;;  %s249_s2 = inlined_call_operand.vmem [shape: f32[1,8], index: 2, kind: input, shape index: {}]   ;;  %s250_s4 = inlined_call_operand.vmem [shape: f32[1,32], index: 4, kind: input, shape index: {}]   ;;  %s251_s5 = inlined_call_operand.vmem [shape: f32[16,32], index: 5, kind: output, shape index: {0}]   ;;  %s252_s6 = inlined_call_operand.vmem [shape: f32[1,2,32], index: 6, kind: output, shape index: {1}]  }
   0x1   :  { %28 = vst.msk [vmem:[#allocation2] sm:$0xff] %vm27_vm0, %v172_v0  ;;  %29 = vst.msk [vmem:[#allocation2 + $0x8] sm:$0xff] %vm27_vm0, %v172_v0  ;;  %164 = vmatprep.subr.bf16.mxu0 %v172_v0  ;;  %v55_v1 = vld [vmem:[%s246_s3] sm:$0xf]  ;;  %166 = vmatprep.mubr.msk.bf16.mxu0 %vm173_vm2, %v172_v0  ;;  %v31_v3 = vld [vmem:[%s247_s0 + $0x8] sm:$0xff]  ;;  %vm56_vm3 = vcmask 64512  }
   0x2   :  { %v30_v2 = vld [vmem:[%s247_s0] sm:$0xff]  ;;  %v62_v4 = vsel %vm60_vm1, %v55_v1, 0  ;;  %vm146_vm4 = vcmask 1040384   ;;  %vm148_vm5 = vcmask 254976  }
   0x3   :  { %v158_v5 = vld [vmem:[%s248_s1] ss:$0 sm:$0xff]  ;;  %165 = vmatpush3.bf16.msra.mxu0 %v62_v4 }
   0x4   :  { %v159_v6 = vld [vmem:[%s249_s2] ss:$0 sm:$0xff]  ;;  %v39_v7 = vmul.f32 %v158_v5, %v30_v2  ;;  %v40_v8 = vmul.f32 %v158_v5, %v31_v3 }
   0x5   :  { %v161_v22 = vld [vmem:[%s250_s4] ss:$0 sm:$0xff] }
   0x6   :  { %v48_v9 = vadd.f32 %v159_v6, %v39_v7  ;;  %v49_v10 = vadd.f32 %v159_v6, %v40_v8 }
   0x8   :  { %v50_v11 = vmax.f32 %v48_v9, 0.0  ;;  %v51_v12 = vmax.f32 %v49_v10, 0.0  ;;  %v52_v14 = vld [vmem:[#allocation2] sm:$0xff]  ;;  %v53_v16 = vld [vmem:[#allocation2 + $0x8] sm:$0xff] }
   0xa   :  { %v54_v13 = vpack.c.bf16 %v51_v12, %v50_v11 }
   0xc   :  { %167 = vmatmul.mubr.msk.bf16.vlgmr.msra.gmra.mrb[0].mxu0 %vm56_vm3, %v54_v13 }
  0xdf   :  { %v98_v15 = vpop.f32.mrb[0].mxu0 }
  0xe0   :  { %v105_v17 = vadd.f32 %v98_v15, %v52_v14  ;;  %v168_v18 = vpop.f32.mrb[1].mxu0 }
  0xe1   :  { %v101_v19 = vpop.f32.mrb[2].mxu0 }
  0xe2   :  { %108 = vst.msk [vmem:[#allocation2] sm:$0xff] %vm27_vm0, %v105_v17  ;;  %v106_v20 = vadd.f32 %v101_v19, %v53_v16  ;;  %v169_v21 = vpop.f32.mrb[3].mxu0 }
  0xe4   :  { %109 = vst.msk [vmem:[#allocation2 + $0x8] sm:$0xff] %vm27_vm0, %v106_v20 }
  0xe9   :  { %v113_v23 = vld [vmem:[#allocation2] sm:$0xff] }
  0xea   :  { %v122_v24 = vadd.f32 %v161_v22, %v113_v23 }
  0xeb   :  { %v114_v25 = vld [vmem:[#allocation2 + $0x8] sm:$0xff] }
  0xec   :  { %124 = vst.msk [vmem:[%s251_s5] sm:$0xff] %vm27_vm0, %v122_v24  ;;  %v135_v26 = vmul.f32 %v122_v24, %v122_v24  ;;  %v123_v27 = vadd.f32 %v161_v22, %v114_v25  ;;  %v126_v28 = vsel %vm27_vm0, %v122_v24, 0.0 }
  0xee   :  { %125 = vst.msk [vmem:[%s251_s5 + $0x8] sm:$0xff] %vm27_vm0, %v123_v27  ;;  %v127_v29 = vsel %vm27_vm0, %v123_v27, 0.0  ;;  %v136_v30 = vmul.f32 %v123_v27, %v123_v27  ;;  %v137_v32 = vsel %vm27_vm0, %v135_v26, 0.0 }
  0xef   :  { %v128_v31 = vadd.f32 %v127_v29, %v126_v28 }
  0xf0   :  { %v138_v33 = vsel %vm27_vm0, %v136_v30, 0.0 }
  0xf1   :  { %v129_v34 = vrot.slane %v128_v31, 4  ;;  %v139_v35 = vadd.f32 %v138_v33, %v137_v32 }
  0xf3   :  { %v130_v36 = vadd.f32 %v129_v34, %v128_v31  ;;  %v140_v37 = vrot.slane %v139_v35, 4 }
  0xf5   :  { %v131_v38 = vrot.slane %v130_v36, 2  ;;  %v141_v39 = vadd.f32 %v140_v37, %v139_v35 }
  0xf7   :  { %v132_v40 = vadd.f32 %v131_v38, %v130_v36  ;;  %v142_v41 = vrot.slane %v141_v39, 2 }
  0xf9   :  { %v133_v42 = vrot.slane %v132_v40, 1  ;;  %v143_v43 = vadd.f32 %v142_v41, %v141_v39 }
  0xfb   :  { %v144_v44 = vrot.slane %v143_v43, 1  ;;  %v134_v45 = vadd.f32 %v133_v42, %v132_v40 }
  0xfd   :  { %v145_v46 = vadd.f32 %v144_v44, %v143_v43 }
  0xff   :  { %v147_v47 = vsel %vm146_vm4, %v134_v45, %v145_v46 }
 0x100   :  { %149 = vst.msk [vmem:[%s252_s6] sm:$0x3] %vm148_vm5, %v147_v47 }

// kernel: gd_forward.7
= control target key start
LH: loop header
LB: loop body
LE: loop exit
PB: predicated region body
PF: predicated region fallthrough
CT: control target
= control target key end

     0   :  { %s344_s6 = smov 0   ;;  %s361_s0 = inlined_call_operand.vmem [shape: f32[2,4,8], index: 0, kind: input, shape index: {}]   ;;  %s362_s1 = inlined_call_operand.vmem [shape: f32[2,4,4], index: 1, kind: output, shape index: {}]  }
   0x1 LB: > { %s294_s7 = sadd.s32 4294967295, %s330_s6   ;;  %p298_p0 = scmp.ge.s32.totalorder %s330_s6, 1  ;;  %s330_s6 = sphi %s344_s6, %s11_s6  }
   0x2   : > { %p86_p1 = scmp.lt.s32.totalorder %s330_s6, 3 }
   0x4   : > { %p87_p2 = pnand %p298_p0, %p86_p1 }
   0x5   : > { %p104_p3 = scmp.lt.s32.totalorder (!%p87_p2), %s294_s7, 1  ;;  %v332_v0 = vmov (!%p87_p2), 0.0   ;;  %vm333_vm0 = vmmov (!%p87_p2), 0   ;;  %vm118_vm1 = vcmask (!%p87_p2), 64512   ;;  %vm114_vm2 = vcmask (!%p87_p2), 60416  }
   0x6   : > { %90 = sbr.rel (%p87_p2) target bundleno = 315 (0x13b), region = 24  ;;  %307 = vmatprep.subr.mxu0 (!%p87_p2), %v332_v0  ;;  %309 = vmatprep.mubr.msk.f32.mxu0 (!%p87_p2), %vm333_vm0, %v332_v0  ;;  %v224_v7 = vlaneseq (!%p87_p2)  ;;  %vm239_vm4 = vcmask (!%p87_p2), 27648  }
   0x8   : > { %v225_v8 = vshrl.u32 (!%p87_p2), %v224_v7, 7 }
   0xa   : > { %v226_v9 = vsub.s32 (!%p87_p2), 0, %v225_v8 }
   0xd   : > { %s364_s7 = smov (!%p104_p3, %s294_s7), 1 }
   0xe   : > { %s299_s8 = sshll.u32 %s364_s7, 2 }
   0xf   : > { %s107_s11 = scalar_lea.vmem %s361_s0, %s299_s8  ;;  %s111_s14 = scalar_lea.vmem %s362_s1, %s299_s8 }
  0x10   : > { %v112_v1 = vld [vmem:[%s107_s11] sm:$0xf] }
  0x11   : > { %v113_v2 = vmul.f32 %v112_v1, %v112_v1  ;;  %308 = vmatpush3.xpose.msk.msra.mxu0 %vm118_vm1, %v112_v1 }
  0x13   : > { %v115_v3 = vsel %vm114_vm2, %v113_v2, 0.0 }
  0x14   : > { %116 = vadd.xlane.f32.xlu0 %v115_v3  ;;  %310 = vmatmul.mubr.msk.f32.vlgmr.msra.gmra.mrb[0].mxu0 %vm118_vm1, %v112_v1 }
  0xa1   : > { %v117_v4 = vpop.xlane.xlu0 %116 }
  0xa2   : > { %192 = vxpose.xlu0.b32.start.end [1/1] (short) (narrow) %v117_v4, 8 }
  0xe7   : > { %v188_v5 = vpop.f32.mrb[0].mxu0 }
  0xe8   : > { %v311_v6 = vpop.f32.mrb[1].mxu0  ;;  %v229_v12 = vmul.f32 2.0, %v188_v5 }
 0x122   : > { %v208_v10 = vpop.trf.xlu0 }
 0x123   : > { %v227_v11 = vrot.slane %v208_v10, %v226_v9 }
 0x125   : > { %v228_v13 = vadd.f32 %v227_v11, %v117_v4 }
 0x127   : > { %v230_v14 = vsub.f32 %v228_v13, %v229_v12 }
 0x129   : > { %v231_v15 = vmax.f32 %v230_v14, 0.0 }
 0x12b   : > { %322 = vrsqrt.f32 %v231_v15  ;;  %vm234_vm3 = vcmp.eq.f32.partialorder %v231_v15, inf  ;;  %v237_v18 = vand.u32 2147483648, %v231_v15  ;;  %vm236_vm5 = vcmp.eq.f32.partialorder %v231_v15, 0.0 }
 0x135   : > { %v323_v16 = vpop.eup %322 }
 0x136   : > { %v233_v17 = vmul.f32 %v323_v16, %v231_v15 }
 0x138   : > { %v235_v19 = vsel %vm234_vm3, %v231_v15, %v233_v17 }
 0x139   : > { %v238_v20 = vsel %vm236_vm5, %v237_v18, %v235_v19 }
 0x13a   : > { %240 = vst.msk [vmem:[%s111_s14] sm:$0xf] %vm239_vm4, %v238_v20 }
 0x13b PF: > { %s11_s6 = sadd.s32 1, %s330_s6  }
 0x13c   : > { %p8_p4 = scmp.ge.s32.totalorder %s11_s6, 4  }
 0x13e   :  { %10 = sbr.rel (!%p8_p4) target bundleno = 1 (0x1), region = 54 }

// kernel: squeeze.10
= control target key start
LH: loop header
LB: loop body
LE: loop exit
PB: predicated region body
PF: predicated region fallthrough
CT: control target
= control target key end

     0   :  { %s101_s0 = inlined_call_operand.vmem [shape: f32[32], index: 0, kind: input, shape index: {}]   ;;  %s102_s1 = inlined_call_operand.hbm [shape: f32[4,8], index: 1, kind: output, shape index: {}]  }
   0x1   :  { %v5_v0 = vld [vmem:[%s101_s0] sm:$0x1] }
   0x2   :  { %6 = vst [vmem:[#allocation3] sm:$0x1] %v5_v0 }
   0x3   :  { %2 = vsyncpa [#allocation1], 0  ;;  %s72_s0 = smov 120   ;;  %s73_s8 = smov 104   ;;  %vm8_vm0 = vcmask 64512  }
   0x4   :  { %s74_s9 = smov 112   ;;  %s75_s10 = smov [#allocation0]  }
   0x5   :  { %s38_s11 = sshll.u32 %s75_s10, 4  ;;  %s39_s11 = int_to_ptr.vmem [resolvable:$true] %s38_s11 }
   0x6   :  { %s48_s12 = scalar_lea.vmem %s39_s11, 64  ;;  %p53_p1 = scmp.lt.s32.totalorder %s39_s11, %s39_s11 }
   0x7   :  { %p49_p0 = scmp.ne.s32.totalorder %s39_s11, %s48_s12  ;;  %p54_p2 = scmp.lt.s32.totalorder %s48_s12, %s48_s12 }
   0x9   :  { %v10_v1 = vld [vmem:[#allocation3] sm:$0x1]   ;;  %p55_p3 = por %p54_p2, %p53_p1 }
   0xa   :  { %v22_v2 = vld [vmem:[#allocation3] sm:$0x1]   ;;  %11 = vrot.lane.b32.xlu0 %v10_v1, %s72_s0 }
   0xb   :  { %23 = vrot.lane.b32.xlu1 %v22_v2, %s73_s8  ;;  %v7_v3 = vld [vmem:[#allocation3] sm:$0x1]   ;;  %p56_p4 = pnand %p55_p3, %p49_p0 }
   0xc   :  { %v16_v4 = vld [vmem:[#allocation3] sm:$0x1]   ;;  %9 = vst.msk [vmem:[#allocation2] sm:$0x1] %vm8_vm0, %v7_v3  }
   0xe   :  { %17 = vrot.lane.b32.xlu0 %v16_v4, %s74_s9 }
  0x7c   :  { %v12_v5 = vpop.permute.xlu0 %11  }
  0x7d   :  { %v24_v6 = vpop.permute.xlu1 %23   ;;  %15 = vst.msk [vmem:[#allocation2 + $0x1] sm:$0x1] %vm8_vm0, %v12_v5  }
  0x7e   :  { %27 = vst.msk [vmem:[#allocation2 + $0x3] sm:$0x1] %vm8_vm0, %v24_v6  }
  0x80   :  { %v18_v7 = vpop.permute.xlu0 %17  }
  0x81   :  { %21 = vst.msk [vmem:[#allocation2 + $0x2] sm:$0x1] %vm8_vm0, %v18_v7  }
  0x88   :  { %v31_v8 = vld [vmem:[#allocation2] sm:$0xf] }
  0x89   :  { %33 = vst [vmem:[#allocation0] sm:$0xf] %v31_v8 }
  0x8a   :  { %59 = shalt.err (!%p56_p4)
}
  0x8b   :  { %s60_s15 = scalar_lea.hbm %s102_s1, 64 }
  0x8c   :  { %p61_p5 = scmp.ne.s32.totalorder %s102_s1, %s60_s15  ;;  %p64_p6 = scmp.lt.u32.totalorder %s60_s15, %s102_s1 }
  0x8e   :  { %p66_p7 = pnand %p64_p6, %p61_p5 }
  0x90   :  { %69 = shalt.err (!%p66_p7)
}
  0x91   :  { %41 = dma.vmem_to_hbm [thread:$0]  %s39_s11, 64, %s102_s1, [#allocation1]  }
  0x92   :  { %70 = dma.done.wait [#allocation1], 64  }
  0x93   :  { %71 = vsyncadd [#allocation1], 4294967232 }
  0x94   :  { %43 = vsyncpa [#allocation1], 1 }

</bundles_post_ra>
